<compile_context>
chip_gen: v7x
topology: tpu7x:2x2x1
jax: 0.10.0
libtpu: 0.0.40
codegen_flags: <defaults>
</compile_context>

<pallas_src>
import functools

import jax
import jax.numpy as jnp
from jax.experimental import pallas as pl
from jax.experimental.pallas import tpu as pltpu


# -----------------------------------------------------------------------------
# Tile selection helper
# -----------------------------------------------------------------------------
def _choose_tile(dim, limit, align):
    """Largest `align`-multiple divisor of `dim` that is <= limit, else `dim`.

    Returning `dim` (the full extent) is always a legal block shape, so the
    fallback never violates the (8,128) rule -- it just gives up tiling that
    axis.
    """
    if dim <= limit:
        return dim
    cap = (limit // align) * align
    for cand in range(cap, 0, -align):
        if dim % cand == 0:
            return cand
    return dim


# -----------------------------------------------------------------------------
# Kernel A: tiled (M, K) @ (K, N) + bias -> (M, N), f32 accumulation.
# Used for the hoisted, all-timesteps input projection x @ W_ih1 + b1.  The K
# axis is the (last) reduction grid dimension so the huge (D, 4H) weight is
# streamed tile by tile; the N axis is parallel (second TensorCore on v7x).
# -----------------------------------------------------------------------------
def _matmul_bias_kernel(x_ref, w_ref, b_ref, o_ref, acc_ref):
    k = pl.program_id(2)

    @pl.when(k == 0)
    def _():
        acc_ref[...] = jnp.zeros_like(acc_ref)

    acc_ref[...] += jnp.dot(x_ref[...], w_ref[...],
                            preferred_element_type=jnp.float32)

    @pl.when(k == pl.num_programs(2) - 1)
    def _():
        o_ref[...] = (acc_ref[...] + b_ref[...]).astype(o_ref.dtype)


def matmul_bias(x, w, b, *, vmem_budget_bytes=32 * 1024 * 1024):
    """x: (M, K), w: (K, N) (bf16 recommended), b: (1, N) f32 -> (M, N) f32."""
    M, K = x.shape
    K2, N = w.shape
    assert K == K2 and b.shape == (1, N)
    isz = jnp.dtype(x.dtype).itemsize
    m_align = 16 if isz == 2 else 8

    tm = _choose_tile(M, 256, m_align)          # M = T*B is tiny for this model
    tn = _choose_tile(N, 1024, 128)             # split N -> 2nd TC on v7x

    # K tile sized from a VMEM budget: 2x(x tile) + 2x(w tile) db'd + f32 acc
    # + 2x(f32 out tile) + bias.  Big tiles amortize the ~0.35us/step grid
    # overhead while still fitting v7x's 64 MiB VMEM.
    fixed = 3 * tm * tn * 4 + 2 * tn * 4
    tk_limit = max((vmem_budget_bytes - fixed) // (2 * isz * (tm + tn)), 128)
    tk = _choose_tile(K, tk_limit, 128)

    need = 2 * tm * tk * isz + 2 * tk * tn * isz + fixed
    vmem_limit = int(min(max(need * 1.4 + (4 << 20), 16 << 20), 56 << 20))

    return pl.pallas_call(
        _matmul_bias_kernel,
        out_shape=jax.ShapeDtypeStruct((M, N), jnp.float32),
        grid_spec=pltpu.PrefetchScalarGridSpec(
            num_scalar_prefetch=0,
            grid=(M // tm, N // tn, K // tk),
            in_specs=[
                pl.BlockSpec((tm, tk), lambda i, j, k: (i, k)),
                pl.BlockSpec((tk, tn), lambda i, j, k: (k, j)),
                pl.BlockSpec((1, tn), lambda i, j, k: (0, j)),
            ],
            out_specs=pl.BlockSpec((tm, tn), lambda i, j, k: (i, j)),
            scratch_shapes=[pltpu.VMEM((tm, tn), jnp.float32)],
        ),
        compiler_params=pltpu.CompilerParams(
            dimension_semantics=("parallel", "parallel", "arbitrary"),
            vmem_limit_bytes=vmem_limit),
    )(x, w, b)


# -----------------------------------------------------------------------------
# Kernel B: skew-interleaved 2-layer LSTM recurrence + fc1 + softmax,
# all in ONE pallas_call invocation (grid=(1,)).
# -----------------------------------------------------------------------------
def _recurrence_kernel(gx1_ref, whh1_ref, w2s_ref, b2_ref, wfc_ref, bfc_ref,
                       out_ref, h2_seq,
                       *, seq_len, batch, hidden, unroll,
                       compute_dtype, approx_softmax):
    T, B, H = seq_len, batch, hidden
    f32 = jnp.float32

    def gate_split(gates):
        # Gate columns are pre-permuted to [i | f | o | g]: one contiguous
        # sigmoid over 3H lanes and one tanh over H lanes (fewer EUP passes
        # and vreg shuffles per serial step).
        sig = jax.nn.sigmoid(gates[:, :3 * H])
        i = sig[:, 0 * H:1 * H]
        f = sig[:, 1 * H:2 * H]
        o = sig[:, 2 * H:3 * H]
        g = jnp.tanh(gates[:, 3 * H:])
        return i, f, o, g

    # Weights are read straight from their VMEM refs inside each dot --
    # hoisting a (H,4H)/(2H,4H) value out of the loop would pin it in vregs
    # and spill; the MXU reads operands from VMEM anyway.
    def layer1_step(t, h1, c1):
        gates = (gx1_ref[pl.ds(t * B, B), :]
                 + jnp.dot(h1.astype(compute_dtype), whh1_ref[...],
                           preferred_element_type=f32))
        i, f, o, g = gate_split(gates)
        c1 = f * c1 + i * g
        h1 = o * jnp.tanh(c1)
        return h1, c1

    def layer2_step(s, h1_s, h2, c2):
        # Fused per-step input: [h1[s], h2[s-1]] @ [[W_ih2],[W_hh2]] -- one
        # (2H,4H) MXU push per serial step instead of two (H,4H) pushes.
        x2 = jnp.concatenate([h1_s, h2], axis=1).astype(compute_dtype)
        gates = (jnp.dot(x2, w2s_ref[...], preferred_element_type=f32)
                 + b2_ref[...])
        i, f, o, g = gate_split(gates)
        c2 = f * c2 + i * g
        h2 = o * jnp.tanh(c2)
        h2_seq[pl.ds(s * B, B), :] = h2
        return h2, c2

    zero = jnp.zeros((B, H), f32)

    # Skewed interleave: iteration t runs layer-1 step t and layer-2 step t-1.
    # The two chains only communicate through the loop carry (layer 2 consumes
    # the *previous* h1), so their matmul + sigmoid/tanh latency chains overlap
    # in the VLIW schedule instead of running as two back-to-back recurrences.
    h1, c1 = layer1_step(0, zero, zero)          # prologue: layer-1 step 0
    h2, c2 = zero, zero

    def skewed(t, carry):
        h1, c1, h2, c2 = carry
        h2n, c2n = layer2_step(t - 1, h1, h2, c2)
        h1n, c1n = layer1_step(t, h1, c1)
        return h1n, c1n, h2n, c2n

    h1, c1, h2, c2 = jax.lax.fori_loop(1, T, skewed, (h1, c1, h2, c2),
                                       unroll=unroll)
    layer2_step(T - 1, h1, h2, c2)               # epilogue: drain the skew

    # -------------- fc1 + softmax, batched over all timesteps ----------------
    # wfc/bfc are lane-padded to 128 classes; padded bias lanes hold -1e30 so
    # exp() underflows to exactly 0 and the softmax over 128 lanes equals the
    # softmax over the real 11 classes; the output store is lane-dense.
    logits = (jnp.dot(h2_seq[...].astype(compute_dtype), wfc_ref[...],
                      preferred_element_type=f32)
              + bfc_ref[...])
    m = jnp.max(logits, axis=-1, keepdims=True)
    e = jnp.exp(logits - m)
    denom = jnp.sum(e, axis=-1, keepdims=True)
    out_ref[...] = (e * pl.reciprocal(denom, approx=approx_softmax)
                    ).astype(out_ref.dtype)


# -----------------------------------------------------------------------------
# Wrapper
# -----------------------------------------------------------------------------
def _permute_gate_cols(a, H):
    """PyTorch LSTM gate order [i|f|g|o] -> kernel order [i|f|o|g], last axis."""
    return jnp.concatenate(
        [a[..., :2 * H], a[..., 3 * H:4 * H], a[..., 2 * H:3 * H]], axis=-1)


def seq_classifier_forward(x, lengths, params, *,
                           compute_dtype=jnp.bfloat16, approx_softmax=True):
    """x: (T, B, D) float32, time-major.  `lengths` is unused (matches PyTorch).

    compute_dtype: dtype of matmul operands (accumulation and all elementwise
    state math stay f32).  bf16 + approx softmax is the production config;
    f32 + exact is used by the self-test.
    """
    del lengths
    T, B, D = x.shape
    H = params["whh1"].shape[0]          # whh1 is (H, 4H)
    C = params["wfc"].shape[1]           # wfc  is (H, C)
    C_pad = ((C + 127) // 128) * 128     # lane-dense output width
    cdt = compute_dtype

    # ---- param prep (trace-time): gate permutation, stacking, casting -------
    wih1 = _permute_gate_cols(params["wih1"], H).astype(cdt)
    whh1 = _permute_gate_cols(params["whh1"], H).astype(cdt)
    b1 = _permute_gate_cols(params["b1"], H)                              # f32
    w2s = jnp.concatenate(
        [_permute_gate_cols(params["wih2"], H),
         _permute_gate_cols(params["whh2"], H)], axis=0).astype(cdt)  # (2H,4H)
    b2 = _permute_gate_cols(params["b2"], H)                              # f32
    wfc = jnp.zeros((H, C_pad), cdt).at[:, :C].set(params["wfc"].astype(cdt))
    bfc = jnp.full((1, C_pad), -1e30, jnp.float32).at[:, :C].set(params["bfc"])

    # ---- hoisted layer-1 input projection: one big streamed GEMM ------------
    gx1 = matmul_bias(x.reshape(T * B, D).astype(cdt), wih1, b1)

    # ---- single-invocation skewed recurrence + fc1 + softmax ----------------
    isz = jnp.dtype(cdt).itemsize
    resident = (2 * (T * B * 4 * H * 4)        # gx1 (f32, double-buffered)
                + 2 * (H * 4 * H * isz)        # whh1
                + 2 * (2 * H * 4 * H * isz)    # [wih2; whh2]
                + 2 * (4 * H * 4)              # b2
                + 2 * (H * C_pad * isz)        # wfc (padded)
                + 2 * (C_pad * 4)              # bfc (padded)
                + 2 * (T * B * C_pad * 4)      # out
                + T * B * H * 4)               # h2_seq scratch
    vmem_limit = int(min(max(resident * 1.4 + (4 << 20), 16 << 20), 56 << 20))

    kernel = functools.partial(
        _recurrence_kernel, seq_len=T, batch=B, hidden=H,
        unroll=min(8, max(T - 1, 1)), compute_dtype=cdt,
        approx_softmax=approx_softmax)

    probs = pl.pallas_call(
        kernel,
        out_shape=jax.ShapeDtypeStruct((T * B, C_pad), jnp.float32),
        grid_spec=pltpu.PrefetchScalarGridSpec(
            num_scalar_prefetch=0,
            grid=(1,),                                        # single invocation
            in_specs=[
                pl.BlockSpec((T * B, 4 * H), lambda i: (0, 0)),   # gx1
                pl.BlockSpec((H, 4 * H), lambda i: (0, 0)),       # W_hh layer 1
                pl.BlockSpec((2 * H, 4 * H), lambda i: (0, 0)),   # [W_ih2; W_hh2]
                pl.BlockSpec((1, 4 * H), lambda i: (0, 0)),       # bias layer 2
                pl.BlockSpec((H, C_pad), lambda i: (0, 0)),       # fc1 W (padded)
                pl.BlockSpec((1, C_pad), lambda i: (0, 0)),       # fc1 b (padded)
            ],
            out_specs=pl.BlockSpec((T * B, C_pad), lambda i: (0, 0)),
            scratch_shapes=[pltpu.VMEM((T * B, H), jnp.float32)],  # h2 per step
        ),
        compiler_params=pltpu.CompilerParams(
            dimension_semantics=("arbitrary",),               # serial recurrence
            vmem_limit_bytes=vmem_limit),
    )(gx1, whh1, w2s, b2, wfc, bfc)

    out = probs.reshape(T, B, C_pad)[:, :, :C]
    # category = torch.stack(out_seq); category.squeeze(1)
    if B == 1:
        out = jnp.squeeze(out, axis=1)
    return out


def make_params(key, input_size, hidden_size, num_classes=11):
    """PyTorch-style uniform(-1/sqrt(H), 1/sqrt(H)) init; weights transposed,
    gates in PyTorch order [i|f|g|o], b_ih + b_hh folded into one bias."""
    H = hidden_size
    k = 1.0 / jnp.sqrt(jnp.float32(H))
    keys = jax.random.split(key, 8)
    u = lambda kk, shape: jax.random.uniform(kk, shape, jnp.float32, -k, k)
    return {
        "wih1": u(keys[0], (input_size, 4 * H)),
        "whh1": u(keys[1], (H, 4 * H)),
        "b1":   u(keys[2], (1, 4 * H)),
        "wih2": u(keys[3], (H, 4 * H)),
        "whh2": u(keys[4], (H, 4 * H)),
        "b2":   u(keys[5], (1, 4 * H)),
        "wfc":  u(keys[6], (H, num_classes)),
        "bfc":  u(keys[7], (1, num_classes)),
    }


def reference_forward(x, params):
    """Pure-JAX reference (lax.scan, PyTorch [i,f,g,o] gate order)."""
    H = params["whh1"].shape[0]

    def cell(x_t, h, c, w_ih, w_hh, b):
        gates = x_t @ w_ih + h @ w_hh + b
        i = jax.nn.sigmoid(gates[:, 0 * H:1 * H])
        f = jax.nn.sigmoid(gates[:, 1 * H:2 * H])
        g = jnp.tanh(gates[:, 2 * H:3 * H])
        o = jax.nn.sigmoid(gates[:, 3 * H:4 * H])
        c = f * c + i * g
        h = o * jnp.tanh(c)
        return h, c

    B = x.shape[1]
    init = (jnp.zeros((B, H)), jnp.zeros((B, H)),
            jnp.zeros((B, H)), jnp.zeros((B, H)))

    def step(carry, x_t):
        h1, c1, h2, c2 = carry
        h1, c1 = cell(x_t, h1, c1, params["wih1"], params["whh1"], params["b1"])
        h2, c2 = cell(h1, h2, c2, params["wih2"], params["whh2"], params["b2"])
        logits = h2 @ params["wfc"] + params["bfc"]
        return (h1, c1, h2, c2), jax.nn.softmax(logits, axis=-1)

    _, out = jax.lax.scan(step, init, x)
    if B == 1:
        out = jnp.squeeze(out, axis=1)
    return out


if __name__ == "__main__":
    # Small shapes consistent with the module (original: input_size=512*7*7,
    # hidden=512, classes=11, batch=1 time-major sequence).
    T, B, D, H, C = 8, 1, 256, 128, 11

    key = jax.random.PRNGKey(0)
    kx, kp = jax.random.split(key)
    x = jax.random.normal(kx, (T, B, D), jnp.float32)
    lengths = jnp.full((B,), T, jnp.int32)   # present in signature, unused
    params = make_params(kp, D, H, C)

    ref = reference_forward(x, params)

    # Exact path (f32 matmul operands, exact reciprocal): tight check.
    out_f32 = jax.block_until_ready(
        seq_classifier_forward(x, lengths, params,
                               compute_dtype=jnp.float32,
                               approx_softmax=False))
    assert out_f32.shape == (T, C), out_f32.shape
    assert jnp.allclose(out_f32, ref, atol=1e-4, rtol=1e-4), "f32 path mismatch"
    assert jnp.allclose(jnp.sum(out_f32, axis=-1), 1.0, atol=1e-4)

    # Production path (bf16 matmul operands, EUP reciprocal): loose check.
    out_fast = jax.block_until_ready(seq_classifier_forward(x, lengths, params))
    assert out_fast.shape == (T, C), out_fast.shape
    assert jnp.allclose(out_fast, ref, atol=5e-2), "bf16 path mismatch"
    assert jnp.allclose(jnp.sum(out_fast, axis=-1), 1.0, atol=5e-3)

    print("KERNEL_OK")
</pallas_src>

<mosaic_0001>
module attributes {stable_mosaic.version = 11 : i64} {
  func.func @_matmul_bias_kernel(%arg0: i32, %arg1: i32, %arg2: i32, %arg3: memref<8x256xf32, #tpu.memory_space<vmem>>, %arg4: memref<256x512xf32, #tpu.memory_space<vmem>>, %arg5: memref<1x512xf32, #tpu.memory_space<vmem>>, %arg6: memref<8x512xf32, #tpu.memory_space<vmem>>, %arg7: memref<8x512xf32, #tpu.memory_space<vmem>>) attributes {dimension_semantics = [#tpu.dimension_semantics<parallel>, #tpu.dimension_semantics<parallel>, #tpu.dimension_semantics<arbitrary>], iteration_bounds = array<i64: 1, 1, 1>, scalar_prefetch = 0 : i64, scratch_operands = 1 : i64, tpu.core_type = #tpu.core_type<tc>, window_params = [{transform_indices = @transform_0, window_bounds = array<i64: 8, 256>}, {transform_indices = @transform_1, window_bounds = array<i64: 256, 512>}, {transform_indices = @transform_2, window_bounds = array<i64: 1, 512>}, {transform_indices = @transform_3, window_bounds = array<i64: 8, 512>}]} {
    %c0_i32 = arith.constant 0 : i32
    %0 = arith.cmpi eq, %arg2, %c0_i32 : i32
    %1 = arith.extui %0 : i1 to i32
    %c0_i32_0 = arith.constant 0 : i32
    %2 = arith.cmpi ne, %1, %c0_i32_0 : i32
    scf.if %2 {
      %cst_10 = arith.constant 0.000000e+00 : f32
      %12 = vector.broadcast %cst_10 : f32 to vector<8x512xf32>
      %c0_11 = arith.constant 0 : index
      %c0_12 = arith.constant 0 : index
      %13 = vector.load %arg7[%c0_11, %c0_12] : memref<8x512xf32, #tpu.memory_space<vmem>>, vector<8x512xf32>
      tpu.vector_store %arg7[%c0_11, %c0_12], %12 {strides = array<i32>} : memref<8x512xf32, #tpu.memory_space<vmem>>, vector<8x512xf32>,
    } else {
    }
    %c0 = arith.constant 0 : index
    %c0_1 = arith.constant 0 : index
    %3 = vector.load %arg7[%c0, %c0_1] : memref<8x512xf32, #tpu.memory_space<vmem>>, vector<8x512xf32>
    %c0_2 = arith.constant 0 : index
    %c0_3 = arith.constant 0 : index
    %4 = vector.load %arg3[%c0_2, %c0_3] : memref<8x256xf32, #tpu.memory_space<vmem>>, vector<8x256xf32>
    %c0_4 = arith.constant 0 : index
    %c0_5 = arith.constant 0 : index
    %5 = vector.load %arg4[%c0_4, %c0_5] : memref<256x512xf32, #tpu.memory_space<vmem>>, vector<256x512xf32>
    %cst = arith.constant dense<0.000000e+00> : vector<8x512xf32>
    %6 = tpu.matmul %4, %5, %cst {dimension_numbers = #tpu.dot_dimension_numbers<[1], [0], [0], [1], [0, 0, 1, 1], [], []>} : vector<8x256xf32>, vector<256x512xf32>, vector<8x512xf32> -> vector<8x512xf32>
    %7 = arith.addf %3, %6 : vector<8x512xf32>
    %c0_6 = arith.constant 0 : index
    %c0_7 = arith.constant 0 : index
    %8 = vector.load %arg7[%c0_6, %c0_7] : memref<8x512xf32, #tpu.memory_space<vmem>>, vector<8x512xf32>
    tpu.vector_store %arg7[%c0_6, %c0_7], %7 {strides = array<i32>} : memref<8x512xf32, #tpu.memory_space<vmem>>, vector<8x512xf32>,
    %c0_i32_8 = arith.constant 0 : i32
    %9 = arith.cmpi eq, %arg2, %c0_i32_8 : i32
    %10 = arith.extui %9 : i1 to i32
    %c0_i32_9 = arith.constant 0 : i32
    %11 = arith.cmpi ne, %10, %c0_i32_9 : i32
    scf.if %11 {
      %c0_10 = arith.constant 0 : index
      %c0_11 = arith.constant 0 : index
      %12 = vector.load %arg7[%c0_10, %c0_11] : memref<8x512xf32, #tpu.memory_space<vmem>>, vector<8x512xf32>
      %c0_12 = arith.constant 0 : index
      %c0_13 = arith.constant 0 : index
      %13 = vector.load %arg5[%c0_12, %c0_13] : memref<1x512xf32, #tpu.memory_space<vmem>>, vector<1x512xf32>
      %14 = vector.broadcast %13 : vector<1x512xf32> to vector<8x512xf32>
      %15 = arith.addf %12, %14 : vector<8x512xf32>
      %c0_14 = arith.constant 0 : index
      %c0_15 = arith.constant 0 : index
      %16 = vector.load %arg6[%c0_14, %c0_15] : memref<8x512xf32, #tpu.memory_space<vmem>>, vector<8x512xf32>
      tpu.vector_store %arg6[%c0_14, %c0_15], %15 {strides = array<i32>} : memref<8x512xf32, #tpu.memory_space<vmem>>, vector<8x512xf32>,
    } else {
    }
    return
  }
  func.func @transform_0(%arg0: i32, %arg1: i32, %arg2: i32) -> (i32, i32) {
    %c0_i32 = arith.constant 0 : i32
    return %arg0, %arg2 : i32, i32
  }
  func.func @transform_1(%arg0: i32, %arg1: i32, %arg2: i32) -> (i32, i32) {
    %c0_i32 = arith.constant 0 : i32
    return %arg2, %arg1 : i32, i32
  }
  func.func @transform_2(%arg0: i32, %arg1: i32, %arg2: i32) -> (i32, i32) {
    %c0_i32 = arith.constant 0 : i32
    %c0_i32_0 = arith.constant 0 : i32
    return %c0_i32, %arg1 : i32, i32
  }
  func.func @transform_3(%arg0: i32, %arg1: i32, %arg2: i32) -> (i32, i32) {
    %c0_i32 = arith.constant 0 : i32
    return %arg0, %arg1 : i32, i32
  }
}

</mosaic_0001>

<bundles_post_ra>
// kernel: tpu_custom_call.1
= control target key start
LH: loop header
LB: loop body
LE: loop exit
PB: predicated region body
PF: predicated region fallthrough
CT: control target
= control target key end

     0   :  { %8 = vsyncpa [#allocation4], 0  ;;  %s662_s0 = inlined_call_operand.hbm [shape: f32[8,256], index: 0, kind: input, shape index: {}]   ;;  %s663_s1 = inlined_call_operand.hbm [shape: f32[256,512], index: 1, kind: input, shape index: {}]   ;;  %s664_s2 = inlined_call_operand.vmem [shape: f32[1,512], index: 2, kind: input, shape index: {}]   ;;  %s665_s3 = inlined_call_operand.hbm [shape: f32[8,512], index: 3, kind: output, shape index: {}]  }
   0x1   :  { %9 = vsyncpa [#allocation7], 0 }
   0x2   :  { %10 = vsyncpa [#allocation5], 0  ;;  %s591_s12 = smov [#allocation3]   ;;  %s592_s14 = smov [#allocation6]  }
   0x3   :  { %s17_s13 = sshll.u32 %s591_s12, 4  ;;  %s26_s15 = sshll.u32 %s592_s14, 4  ;;  %s18_s13 = int_to_ptr.vmem [resolvable:$true] %s17_s13  ;;  %s616_s15 = int_to_ptr.vmem [resolvable:$true] %s26_s15 }
   0x4   :  { %s519_s18 = scalar_lea.hbm %s662_s0, 256 }
   0x5   :  { %p520_p0 = scmp.ne.s32.totalorder %s662_s0, %s519_s18  ;;  %p523_p1 = scmp.lt.u32.totalorder %s519_s18, %s662_s0 }
   0x7   :  { %p525_p2 = pnand %p523_p1, %p520_p0 }
   0x9   :  { %528 = shalt.err (!%p525_p2)
}
   0xa   :  { %s529_s23 = scalar_lea.vmem %s18_s13, 256  ;;  %p534_p4 = scmp.lt.s32.totalorder %s18_s13, %s18_s13 }
   0xb   :  { %p530_p3 = scmp.ne.s32.totalorder %s18_s13, %s529_s23  ;;  %p535_p5 = scmp.lt.s32.totalorder %s529_s23, %s529_s23 }
   0xd   :  { %p536_p6 = por %p535_p5, %p534_p4 }
   0xf   :  { %p537_p7 = pnand %p536_p6, %p530_p3 }
  0x11   :  { %540 = shalt.err (!%p537_p7)
}
  0x12   :  { %20 = dma.hbm_to_vmem [thread:$0]  %s662_s0, 256, %s18_s13, [#allocation4]  }
  0x13   :  { %s541_s28 = scalar_lea.hbm %s663_s1, 16384 }
  0x14   :  { %p542_p8 = scmp.ne.s32.totalorder %s663_s1, %s541_s28  ;;  %p545_p9 = scmp.lt.u32.totalorder %s541_s28, %s663_s1 }
  0x16   :  { %p547_p10 = pnand %p545_p9, %p542_p8 }
  0x18   :  { %550 = shalt.err (!%p547_p10)
}
  0x19   :  { %s551_s6 = scalar_lea.vmem %s616_s15, 16384  ;;  %p556_p12 = scmp.lt.s32.totalorder %s616_s15, %s616_s15 }
  0x1a   :  { %p552_p11 = scmp.ne.s32.totalorder %s616_s15, %s551_s6  ;;  %p557_p13 = scmp.lt.s32.totalorder %s551_s6, %s551_s6 }
  0x1c   :  { %p558_p0 = por %p557_p13, %p556_p12 }
  0x1e   :  { %p559_p1 = pnand %p558_p0, %p552_p11 }
  0x20   :  { %562 = shalt.err (!%p559_p1)
}
  0x21   :  { %s593_s0 = smov 512   ;;  %s594_s7 = smov 32  }
  0x22   :  { %32 = dma.hbm_to_vmem [thread:$0]  %s663_s1, 16384, %s616_s15, [#allocation7], %s593_s0, %s593_s0, %s594_s7  }
  0x23   :  { %585 = dma.done.wait [#allocation4], 256  }
  0x24   :  { %586 = vsyncadd [#allocation4], 4294967040 }
  0x25   :  { %587 = dma.done.wait [#allocation7], 16384  }
  0x26   :  { %588 = vsyncadd [#allocation7], 4294950912  ;;  %v56_v0 = vld [vmem:[#allocation6 + $0x8] sm:$0xff]  ;;  %v58_v2 = vld [vmem:[#allocation6 + $0x18] sm:$0xff]  ;;  %s595_s11 = smov [#allocation8]  }
  0x27   :  { %v60_v1 = vld [vmem:[#allocation6 + $0x28] sm:$0xff]  ;;  %v62_v4 = vld [vmem:[#allocation6 + $0x38] sm:$0xff]  ;;  %v55_v5 = vld [vmem:[#allocation6] sm:$0xff]  ;;  %s376_s12 = sshll.u32 %s595_s11, 4  ;;  %s377_s12 = int_to_ptr.vmem [resolvable:$true] %s376_s12 }
  0x28   :  { %v386_v3 = vpack.c.bf16 %v60_v1, %v56_v0  ;;  %v59_v6 = vld [vmem:[#allocation6 + $0x20] sm:$0xff]  ;;  %v450_v7 = vpack.c.bf16 %v62_v4, %v58_v2  ;;  %v57_v9 = vld [vmem:[#allocation6 + $0x10] sm:$0xff]  ;;  %v64_v11 = vld [vmem:[#allocation6 + $0x48] sm:$0xff]  ;;  %p568_p3 = scmp.lt.s32.totalorder %s377_s12, %s377_s12 }
  0x29   :  { %v388_v8 = vpack.c.bf16 %v59_v6, %v55_v5  ;;  %v61_v10 = vld [vmem:[#allocation6 + $0x30] sm:$0xff]  ;;  %v68_v13 = vld [vmem:[#allocation6 + $0x68] sm:$0xff]  ;;  %v66_v14 = vld [vmem:[#allocation6 + $0x58] sm:$0xff] }
  0x2a   :  { %387 = vmatprep.subr.bf16.mxu0 %v386_v3  ;;  %v452_v12 = vpack.c.bf16 %v61_v10, %v57_v9  ;;  %v70_v15 = vld [vmem:[#allocation6 + $0x78] sm:$0xff]  ;;  %451 = vmatprep.subr.bf16.mxu1 %v450_v7  ;;  %v390_v16 = vpack.c.bf16 %v68_v13, %v64_v11  ;;  %v63_v18 = vld [vmem:[#allocation6 + $0x40] sm:$0xff]  ;;  %v65_v20 = vld [vmem:[#allocation6 + $0x50] sm:$0xff] }
  0x2b   :  { %389 = vmatpush1.bf16.msra.mxu0 %v388_v8  ;;  %v454_v17 = vpack.c.bf16 %v70_v15, %v66_v14  ;;  %v67_v19 = vld [vmem:[#allocation6 + $0x60] sm:$0xff]  ;;  %v69_v22 = vld [vmem:[#allocation6 + $0x70] sm:$0xff]  ;;  %v72_v23 = vld [vmem:[#allocation6 + $0x88] sm:$0xff] }
  0x2c   :  { %453 = vmatpush1.bf16.msra.mxu1 %v452_v12  ;;  %v392_v21 = vpack.c.bf16 %v67_v19, %v63_v18  ;;  %v76_v24 = vld [vmem:[#allocation6 + $0xa8] sm:$0xff]  ;;  %391 = vmatprep.subr.bf16.mxu0 %v390_v16  ;;  %v456_v25 = vpack.c.bf16 %v69_v22, %v65_v20  ;;  %v74_v27 = vld [vmem:[#allocation6 + $0x98] sm:$0xff]  ;;  %v71_v29 = vld [vmem:[#allocation6 + $0x80] sm:$0xff] }
  0x2d   :  { %455 = vmatprep.subr.bf16.mxu1 %v454_v17  ;;  %v394_v26 = vpack.c.bf16 %v76_v24, %v72_v23  ;;  %v78_v28 = vld [vmem:[#allocation6 + $0xb8] sm:$0xff]  ;;  %v75_v31 = vld [vmem:[#allocation6 + $0xa0] sm:$0xff]  ;;  %v73_v32 = vld [vmem:[#allocation6 + $0x90] sm:$0xff] }
  0x2e   :  { %v458_v30 = vpack.c.bf16 %v78_v28, %v74_v27  ;;  %v77_v33 = vld [vmem:[#allocation6 + $0xb0] sm:$0xff]  ;;  %v396_v34 = vpack.c.bf16 %v75_v31, %v71_v29  ;;  %v80_v35 = vld [vmem:[#allocation6 + $0xc8] sm:$0xff]  ;;  %v82_v37 = vld [vmem:[#allocation6 + $0xd8] sm:$0xff] }
  0x2f   :  { %393 = vmatpush1.bf16.msra.mxu0 %v392_v21  ;;  %v84_v36 = vld [vmem:[#allocation6 + $0xe8] sm:$0xff]  ;;  %v460_v38 = vpack.c.bf16 %v77_v33, %v73_v32  ;;  %v86_v40 = vld [vmem:[#allocation6 + $0xf8] sm:$0xff]  ;;  %v79_v41 = vld [vmem:[#allocation6 + $0xc0] sm:$0xff] }
  0x30   :  { %457 = vmatpush1.bf16.msra.mxu1 %v456_v25  ;;  %395 = vmatprep.subr.bf16.mxu0 %v394_v26  ;;  %v398_v39 = vpack.c.bf16 %v84_v36, %v80_v35  ;;  %v83_v42 = vld [vmem:[#allocation6 + $0xe0] sm:$0xff]  ;;  %v462_v43 = vpack.c.bf16 %v86_v40, %v82_v37  ;;  %v81_v44 = vld [vmem:[#allocation6 + $0xd0] sm:$0xff]  ;;  %v88_v46 = vld [vmem:[#allocation6 + $0x108] sm:$0xff] }
  0x31   :  { %459 = vmatprep.subr.bf16.mxu1 %v458_v30  ;;  %v85_v45 = vld [vmem:[#allocation6 + $0xf0] sm:$0xff]  ;;  %v92_v47 = vld [vmem:[#allocation6 + $0x128] sm:$0xff]  ;;  %v90_v48 = vld [vmem:[#allocation6 + $0x118] sm:$0xff]  ;;  %v400_v50 = vpack.c.bf16 %v83_v42, %v79_v41 }
  0x32   :  { %v94_v49 = vld [vmem:[#allocation6 + $0x138] sm:$0xff]  ;;  %v464_v51 = vpack.c.bf16 %v85_v45, %v81_v44  ;;  %v402_v52 = vpack.c.bf16 %v92_v47, %v88_v46  ;;  %v87_v53 = vld [vmem:[#allocation6 + $0x100] sm:$0xff]  ;;  %v89_v55 = vld [vmem:[#allocation6 + $0x110] sm:$0xff] }
  0x33   :  { %397 = vmatpush1.bf16.msra.mxu0 %v396_v34  ;;  %v91_v54 = vld [vmem:[#allocation6 + $0x120] sm:$0xff]  ;;  %v466_v56 = vpack.c.bf16 %v94_v49, %v90_v48  ;;  %v93_v57 = vld [vmem:[#allocation6 + $0x130] sm:$0xff]  ;;  %v96_v58 = vld [vmem:[#allocation6 + $0x148] sm:$0xff] }
  0x34   :  { %461 = vmatpush1.bf16.msra.mxu1 %v460_v38  ;;  %399 = vmatprep.subr.bf16.mxu0 %v398_v39  ;;  %v100_v59 = vld [vmem:[#allocation6 + $0x168] sm:$0xff]  ;;  %v98_v60 = vld [vmem:[#allocation6 + $0x158] sm:$0xff]  ;;  %v404_v62 = vpack.c.bf16 %v91_v54, %v87_v53  ;;  %v468_v63 = vpack.c.bf16 %v93_v57, %v89_v55  ;;  %v95_v1 = vld [vmem:[#allocation6 + $0x140] sm:$0xff] }
  0x35   :  { %463 = vmatprep.subr.bf16.mxu1 %v462_v43  ;;  %v102_v61 = vld [vmem:[#allocation6 + $0x178] sm:$0xff]  ;;  %v406_v0 = vpack.c.bf16 %v100_v59, %v96_v58  ;;  %v99_v2 = vld [vmem:[#allocation6 + $0x160] sm:$0xff]  ;;  %v97_v3 = vld [vmem:[#allocation6 + $0x150] sm:$0xff] }
  0x36   :  { %v470_v4 = vpack.c.bf16 %v102_v61, %v98_v60  ;;  %v101_v5 = vld [vmem:[#allocation6 + $0x170] sm:$0xff]  ;;  %v104_v6 = vld [vmem:[#allocation6 + $0x188] sm:$0xff]  ;;  %v106_v8 = vld [vmem:[#allocation6 + $0x198] sm:$0xff]  ;;  %v408_v10 = vpack.c.bf16 %v99_v2, %v95_v1 }
  0x37   :  { %401 = vmatpush1.bf16.msra.mxu0 %v400_v50  ;;  %v108_v7 = vld [vmem:[#allocation6 + $0x1a8] sm:$0xff]  ;;  %v110_v9 = vld [vmem:[#allocation6 + $0x1b8] sm:$0xff]  ;;  %v472_v11 = vpack.c.bf16 %v101_v5, %v97_v3  ;;  %v103_v13 = vld [vmem:[#allocation6 + $0x180] sm:$0xff] }
  0x38   :  { %465 = vmatpush1.bf16.msra.mxu1 %v464_v51  ;;  %403 = vmatprep.subr.bf16.mxu0 %v402_v52  ;;  %v410_v12 = vpack.c.bf16 %v108_v7, %v104_v6  ;;  %v107_v14 = vld [vmem:[#allocation6 + $0x1a0] sm:$0xff]  ;;  %v105_v15 = vld [vmem:[#allocation6 + $0x190] sm:$0xff]  ;;  %v474_v16 = vpack.c.bf16 %v110_v9, %v106_v8  ;;  %v112_v18 = vld [vmem:[#allocation6 + $0x1c8] sm:$0xff] }
  0x39   :  { %467 = vmatprep.subr.bf16.mxu1 %v466_v56  ;;  %v109_v17 = vld [vmem:[#allocation6 + $0x1b0] sm:$0xff]  ;;  %v116_v19 = vld [vmem:[#allocation6 + $0x1e8] sm:$0xff]  ;;  %v114_v20 = vld [vmem:[#allocation6 + $0x1d8] sm:$0xff]  ;;  %v412_v22 = vpack.c.bf16 %v107_v14, %v103_v13 }
  0x3a   :  { %v118_v21 = vld [vmem:[#allocation6 + $0x1f8] sm:$0xff]  ;;  %v476_v23 = vpack.c.bf16 %v109_v17, %v105_v15  ;;  %v414_v24 = vpack.c.bf16 %v116_v19, %v112_v18  ;;  %v111_v25 = vld [vmem:[#allocation6 + $0x1c0] sm:$0xff]  ;;  %v113_v27 = vld [vmem:[#allocation6 + $0x1d0] sm:$0xff] }
  0x3b   :  { %405 = vmatpush1.bf16.msra.mxu0 %v404_v62  ;;  %v115_v26 = vld [vmem:[#allocation6 + $0x1e0] sm:$0xff]  ;;  %v478_v28 = vpack.c.bf16 %v118_v21, %v114_v20  ;;  %v117_v29 = vld [vmem:[#allocation6 + $0x1f0] sm:$0xff]  ;;  %v120_v30 = vld [vmem:[#allocation6 + $0x208] sm:$0xff] }
  0x3c   :  { %469 = vmatpush1.bf16.msra.mxu1 %v468_v63  ;;  %407 = vmatprep.subr.bf16.mxu0 %v406_v0  ;;  %v124_v31 = vld [vmem:[#allocation6 + $0x228] sm:$0xff]  ;;  %v122_v32 = vld [vmem:[#allocation6 + $0x218] sm:$0xff]  ;;  %v416_v34 = vpack.c.bf16 %v115_v26, %v111_v25  ;;  %v480_v35 = vpack.c.bf16 %v117_v29, %v113_v27  ;;  %v119_v37 = vld [vmem:[#allocation6 + $0x200] sm:$0xff] }
  0x3d   :  { %471 = vmatprep.subr.bf16.mxu1 %v470_v4  ;;  %v126_v33 = vld [vmem:[#allocation6 + $0x238] sm:$0xff]  ;;  %v418_v36 = vpack.c.bf16 %v124_v31, %v120_v30  ;;  %v123_v38 = vld [vmem:[#allocation6 + $0x220] sm:$0xff]  ;;  %v121_v39 = vld [vmem:[#allocation6 + $0x210] sm:$0xff] }
  0x3e   :  { %v482_v40 = vpack.c.bf16 %v126_v33, %v122_v32  ;;  %v125_v41 = vld [vmem:[#allocation6 + $0x230] sm:$0xff]  ;;  %v128_v42 = vld [vmem:[#allocation6 + $0x248] sm:$0xff]  ;;  %v130_v44 = vld [vmem:[#allocation6 + $0x258] sm:$0xff]  ;;  %v420_v46 = vpack.c.bf16 %v123_v38, %v119_v37 }
  0x3f   :  { %409 = vmatpush1.bf16.msra.mxu0 %v408_v10  ;;  %v132_v43 = vld [vmem:[#allocation6 + $0x268] sm:$0xff]  ;;  %v134_v45 = vld [vmem:[#allocation6 + $0x278] sm:$0xff]  ;;  %v484_v47 = vpack.c.bf16 %v125_v41, %v121_v39  ;;  %v127_v49 = vld [vmem:[#allocation6 + $0x240] sm:$0xff] }
  0x40   :  { %473 = vmatpush1.bf16.msra.mxu1 %v472_v11  ;;  %411 = vmatprep.subr.bf16.mxu0 %v410_v12  ;;  %v422_v48 = vpack.c.bf16 %v132_v43, %v128_v42  ;;  %v131_v50 = vld [vmem:[#allocation6 + $0x260] sm:$0xff]  ;;  %v129_v51 = vld [vmem:[#allocation6 + $0x250] sm:$0xff]  ;;  %v486_v52 = vpack.c.bf16 %v134_v45, %v130_v44  ;;  %v136_v54 = vld [vmem:[#allocation6 + $0x288] sm:$0xff] }
  0x41   :  { %475 = vmatprep.subr.bf16.mxu1 %v474_v16  ;;  %v133_v53 = vld [vmem:[#allocation6 + $0x270] sm:$0xff]  ;;  %v140_v55 = vld [vmem:[#allocation6 + $0x2a8] sm:$0xff]  ;;  %v138_v56 = vld [vmem:[#allocation6 + $0x298] sm:$0xff]  ;;  %v424_v58 = vpack.c.bf16 %v131_v50, %v127_v49 }
  0x42   :  { %v142_v57 = vld [vmem:[#allocation6 + $0x2b8] sm:$0xff]  ;;  %v488_v59 = vpack.c.bf16 %v133_v53, %v129_v51  ;;  %v426_v60 = vpack.c.bf16 %v140_v55, %v136_v54  ;;  %v135_v61 = vld [vmem:[#allocation6 + $0x280] sm:$0xff]  ;;  %v137_v63 = vld [vmem:[#allocation6 + $0x290] sm:$0xff] }
  0x43   :  { %413 = vmatpush1.bf16.msra.mxu0 %v412_v22  ;;  %v139_v62 = vld [vmem:[#allocation6 + $0x2a0] sm:$0xff]  ;;  %v490_v0 = vpack.c.bf16 %v142_v57, %v138_v56  ;;  %v141_v1 = vld [vmem:[#allocation6 + $0x2b0] sm:$0xff]  ;;  %v144_v2 = vld [vmem:[#allocation6 + $0x2c8] sm:$0xff] }
  0x44   :  { %477 = vmatpush1.bf16.msra.mxu1 %v476_v23  ;;  %415 = vmatprep.subr.bf16.mxu0 %v414_v24  ;;  %v148_v3 = vld [vmem:[#allocation6 + $0x2e8] sm:$0xff]  ;;  %v146_v4 = vld [vmem:[#allocation6 + $0x2d8] sm:$0xff]  ;;  %v428_v6 = vpack.c.bf16 %v139_v62, %v135_v61  ;;  %v143_v7 = vld [vmem:[#allocation6 + $0x2c0] sm:$0xff]  ;;  %v492_v8 = vpack.c.bf16 %v141_v1, %v137_v63 }
  0x45   :  { %479 = vmatprep.subr.bf16.mxu1 %v478_v28  ;;  %v150_v5 = vld [vmem:[#allocation6 + $0x2f8] sm:$0xff]  ;;  %v430_v9 = vpack.c.bf16 %v148_v3, %v144_v2  ;;  %v147_v10 = vld [vmem:[#allocation6 + $0x2e0] sm:$0xff]  ;;  %v145_v11 = vld [vmem:[#allocation6 + $0x2d0] sm:$0xff]  ;;  %v342_v2 = vlaneseq }
  0x46   :  { %v149_v12 = vld [vmem:[#allocation6 + $0x2f0] sm:$0xff]  ;;  %v494_v13 = vpack.c.bf16 %v150_v5, %v146_v4  ;;  %v152_v14 = vld [vmem:[#allocation6 + $0x308] sm:$0xff]  ;;  %v54_v16 = vld [vmem:[#allocation3 + $0x8] sm:$0xff]  ;;  %v432_v19 = vpack.c.bf16 %v147_v10, %v143_v7 }
  0x47   :  { %417 = vmatpush1.bf16.msra.mxu0 %v416_v34  ;;  %v156_v15 = vld [vmem:[#allocation6 + $0x328] sm:$0xff]  ;;  %v154_v17 = vld [vmem:[#allocation6 + $0x318] sm:$0xff]  ;;  %247 = vmatprep.mubr.f32.mxu0 %v54_v16  ;;  %v496_v20 = vpack.c.bf16 %v149_v12, %v145_v11  ;;  %v151_v22 = vld [vmem:[#allocation6 + $0x300] sm:$0xff]  ;;  %v343_v3 = vshrl.u32 %v342_v2, 7 }
  0x48   :  { %481 = vmatpush1.bf16.msra.mxu1 %v480_v35  ;;  %419 = vmatprep.subr.bf16.mxu0 %v418_v36  ;;  %v158_v18 = vld [vmem:[#allocation6 + $0x338] sm:$0xff]  ;;  %v434_v21 = vpack.c.bf16 %v156_v15, %v152_v14  ;;  %v155_v23 = vld [vmem:[#allocation6 + $0x320] sm:$0xff]  ;;  %v153_v24 = vld [vmem:[#allocation6 + $0x310] sm:$0xff] }
  0x49   :  { %483 = vmatprep.subr.bf16.mxu1 %v482_v40  ;;  %318 = vmatprep.mubr.f32.mxu1 %v54_v16  ;;  %v498_v25 = vpack.c.bf16 %v158_v18, %v154_v17  ;;  %v157_v26 = vld [vmem:[#allocation6 + $0x330] sm:$0xff]  ;;  %v160_v27 = vld [vmem:[#allocation6 + $0x348] sm:$0xff]  ;;  %v162_v29 = vld [vmem:[#allocation6 + $0x358] sm:$0xff]  ;;  %v436_v31 = vpack.c.bf16 %v155_v23, %v151_v22  ;;  %v344_v4 = vsub.s32 0, %v343_v3  ;;  %v348_v7 = vsub.s32 1, %v343_v3 }
  0x4a   :  { %v164_v28 = vld [vmem:[#allocation6 + $0x368] sm:$0xff]  ;;  %v166_v30 = vld [vmem:[#allocation6 + $0x378] sm:$0xff]  ;;  %v500_v32 = vpack.c.bf16 %v157_v26, %v153_v24  ;;  %v159_v34 = vld [vmem:[#allocation6 + $0x340] sm:$0xff] }
  0x4b   :  { %421 = vmatpush1.bf16.msra.mxu0 %v420_v46  ;;  %v438_v33 = vpack.c.bf16 %v164_v28, %v160_v27  ;;  %v163_v35 = vld [vmem:[#allocation6 + $0x360] sm:$0xff]  ;;  %v161_v36 = vld [vmem:[#allocation6 + $0x350] sm:$0xff]  ;;  %v502_v37 = vpack.c.bf16 %v166_v30, %v162_v29  ;;  %v168_v39 = vld [vmem:[#allocation6 + $0x388] sm:$0xff] }
  0x4c   :  { %485 = vmatpush1.bf16.msra.mxu1 %v484_v47  ;;  %423 = vmatprep.subr.bf16.mxu0 %v422_v48  ;;  %v165_v38 = vld [vmem:[#allocation6 + $0x370] sm:$0xff]  ;;  %v172_v40 = vld [vmem:[#allocation6 + $0x3a8] sm:$0xff]  ;;  %v170_v41 = vld [vmem:[#allocation6 + $0x398] sm:$0xff]  ;;  %v440_v43 = vpack.c.bf16 %v163_v35, %v159_v34 }
  0x4d   :  { %487 = vmatprep.subr.bf16.mxu1 %v486_v52  ;;  %v174_v42 = vld [vmem:[#allocation6 + $0x3b8] sm:$0xff]  ;;  %v504_v44 = vpack.c.bf16 %v165_v38, %v161_v36  ;;  %v442_v45 = vpack.c.bf16 %v172_v40, %v168_v39  ;;  %v167_v46 = vld [vmem:[#allocation6 + $0x380] sm:$0xff]  ;;  %v169_v48 = vld [vmem:[#allocation6 + $0x390] sm:$0xff] }
  0x4e   :  { %v171_v47 = vld [vmem:[#allocation6 + $0x3a0] sm:$0xff]  ;;  %v506_v49 = vpack.c.bf16 %v174_v42, %v170_v41  ;;  %v173_v50 = vld [vmem:[#allocation6 + $0x3b0] sm:$0xff]  ;;  %v176_v51 = vld [vmem:[#allocation6 + $0x3c8] sm:$0xff] }
  0x4f   :  { %425 = vmatpush1.bf16.msra.mxu0 %v424_v58  ;;  %v180_v52 = vld [vmem:[#allocation6 + $0x3e8] sm:$0xff]  ;;  %v178_v53 = vld [vmem:[#allocation6 + $0x3d8] sm:$0xff]  ;;  %v444_v55 = vpack.c.bf16 %v171_v47, %v167_v46  ;;  %v508_v56 = vpack.c.bf16 %v173_v50, %v169_v48  ;;  %v175_v58 = vld [vmem:[#allocation6 + $0x3c0] sm:$0xff] }
  0x50   :  { %489 = vmatpush1.bf16.msra.mxu1 %v488_v59  ;;  %427 = vmatprep.subr.bf16.mxu0 %v426_v60  ;;  %v182_v54 = vld [vmem:[#allocation6 + $0x3f8] sm:$0xff]  ;;  %v446_v57 = vpack.c.bf16 %v180_v52, %v176_v51  ;;  %v179_v59 = vld [vmem:[#allocation6 + $0x3e0] sm:$0xff]  ;;  %v177_v61 = vld [vmem:[#allocation6 + $0x3d0] sm:$0xff] }
  0x51   :  { %491 = vmatprep.subr.bf16.mxu1 %v490_v0  ;;  %v510_v60 = vpack.c.bf16 %v182_v54, %v178_v53  ;;  %v181_v62 = vld [vmem:[#allocation6 + $0x3f0] sm:$0xff]  ;;  %v448_v63 = vpack.c.bf16 %v179_v59, %v175_v58 }
  0x52   :  { %v512_v0 = vpack.c.bf16 %v181_v62, %v177_v61  ;;  %v53_v1 = vld [vmem:[#allocation3] sm:$0xff] }
  0x53   :  { %429 = vmatpush1.bf16.msra.mxu0 %v428_v6  ;;  %v340_v5 = vld [vmem:[%s664_s2] sm:$0xf]  ;;  %v352_v6 = vsub.s32 2, %v343_v3  ;;  %s563_s2 = scalar_lea.vmem %s377_s12, 512 }
  0x54   :  { %493 = vmatpush1.bf16.msra.mxu1 %v492_v8  ;;  %431 = vmatprep.subr.bf16.mxu0 %v430_v9  ;;  %v356_v8 = vsub.s32 3, %v343_v3  ;;  %v345_v9 = vrot.slane %v340_v5, %v344_v4  ;;  %v349_v11 = vrot.slane %v340_v5, %v348_v7  ;;  %p564_p2 = scmp.ne.s32.totalorder %s377_s12, %s563_s2  ;;  %p569_p4 = scmp.lt.s32.totalorder %s563_s2, %s563_s2 }
  0x55   :  { %495 = vmatprep.subr.bf16.mxu1 %v494_v13  ;;  %v353_v10 = vrot.slane %v340_v5, %v352_v6 }
  0x56   :  { %v357_v12 = vrot.slane %v340_v5, %v356_v8  ;;  %p570_p5 = por %p569_p4, %p568_p3 }
  0x57   :  { %433 = vmatpush1.bf16.msra.mxu0 %v432_v19 }
  0x58   :  { %497 = vmatpush1.bf16.msra.mxu1 %v496_v20  ;;  %435 = vmatprep.subr.bf16.mxu0 %v434_v21  ;;  %p571_p6 = pnand %p570_p5, %p564_p2 }
  0x59   :  { %499 = vmatprep.subr.bf16.mxu1 %v498_v25 }
  0x5b   :  { %437 = vmatpush1.bf16.msra.mxu0 %v436_v31 }
  0x5c   :  { %501 = vmatpush1.bf16.msra.mxu1 %v500_v32  ;;  %439 = vmatprep.subr.bf16.mxu0 %v438_v33 }
  0x5d   :  { %503 = vmatprep.subr.bf16.mxu1 %v502_v37 }
  0x5f   :  { %441 = vmatpush1.bf16.msra.mxu0 %v440_v43 }
  0x60   :  { %505 = vmatpush1.bf16.msra.mxu1 %v504_v44  ;;  %443 = vmatprep.subr.bf16.mxu0 %v442_v45 }
  0x61   :  { %507 = vmatprep.subr.bf16.mxu1 %v506_v49 }
  0x63   :  { %445 = vmatpush1.bf16.msra.mxu0 %v444_v55 }
  0x64   :  { %509 = vmatpush1.bf16.msra.mxu1 %v508_v56  ;;  %447 = vmatprep.subr.bf16.mxu0 %v446_v57 }
  0x65   :  { %511 = vmatprep.subr.bf16.mxu1 %v510_v60 }
  0x67   :  { %449 = vmatpush1.bf16.msra.mxu0 %v448_v63 }
  0x68   :  { %513 = vmatpush1.bf16.msra.mxu1 %v512_v0 }
  0x6a   :  { %248 = vmatmul.mubr.f32.vlgmr.msra.gmra.mrb[0].mxu0 %v53_v1 }
  0x6b   :  { %319 = vmatmul.mubr.f32.vlgmr.msra.gmra.mrb[0].mxu1 %v53_v1 }
 0x13d   :  { %v249_v13 = vpop.f32.mrb[0].mxu0 }
 0x13e   :  { %v362_v14 = vadd.f32 %v345_v9, %v249_v13  ;;  %v320_v15 = vpop.f32.mrb[0].mxu1  ;;  %v251_v16 = vpop.f32.mrb[1].mxu0 }
 0x13f   :  { %v364_v17 = vadd.f32 %v353_v10, %v320_v15  ;;  %v363_v18 = vadd.f32 %v349_v11, %v251_v16  ;;  %v322_v19 = vpop.f32.mrb[1].mxu1 }
 0x140   :  { %366 = vst [vmem:[#allocation8] sm:$0xff] %v362_v14  ;;  %v365_v20 = vadd.f32 %v357_v12, %v322_v19 }
 0x141   :  { %368 = vst [vmem:[#allocation8 + $0x10] sm:$0xff] %v364_v17  ;;  %367 = vst [vmem:[#allocation8 + $0x8] sm:$0xff] %v363_v18 }
 0x142   :  { %369 = vst [vmem:[#allocation8 + $0x18] sm:$0xff] %v365_v20 }
 0x143   :  { %574 = shalt.err (!%p571_p6)
}
 0x144   :  { %s575_s15 = scalar_lea.hbm %s665_s3, 512 }
 0x145   :  { %p576_p7 = scmp.ne.s32.totalorder %s665_s3, %s575_s15  ;;  %p579_p8 = scmp.lt.u32.totalorder %s575_s15, %s665_s3 }
 0x147   :  { %p581_p9 = pnand %p579_p8, %p576_p7 }
 0x149   :  { %584 = shalt.err (!%p581_p9)
}
 0x14a   :  { %379 = dma.vmem_to_hbm [thread:$0]  %s377_s12, 512, %s665_s3, [#allocation5]  }
 0x14b   :  { %589 = dma.done.wait [#allocation5], 512  }
 0x14c   :  { %590 = vsyncadd [#allocation5], 4294966784 }
 0x14d   :  { %383 = vsyncpa [#allocation4], 1 }
 0x14e   :  { %384 = vsyncpa [#allocation7], 1 }
 0x14f   :  { %385 = vsyncpa [#allocation5], 1 }

</bundles_post_ra>
